<compile_context>
chip_gen: v7x
topology: tpu7x:2x2x1
jax: 0.10.0
libtpu: 0.0.40
codegen_flags: <defaults>
</compile_context>

<pallas_src>
import math

import jax
import jax.numpy as jnp
from jax.experimental import pallas as pl
from jax.experimental.pallas import tpu as pltpu

# ----------------------------- configuration -------------------------------
N = 2                    # batch
FILTERS = 16             # args.filters   (Conv2d in_channels)
D_QKV = 16               # args.d_qkv     (Conv2d out_channels)
N_HEAD = 8               # args.dilation  (the H axis of the input)
SEQ_LEN = 32             # args.seq_len
LOCAL_WINDOW = 128       # get_local_mask(local_window_size=128)
D_MODEL = N_HEAD * D_QKV    # 128  (Linear in_features)
D_NORM = N_HEAD * FILTERS   # 128  (Linear out_features / LayerNorm width)
EPS = 1e-5               # torch.nn.LayerNorm default eps


# ----------------------------- Pallas kernel --------------------------------
def aft_local_kernel(x_ref, wqkv_ref, bqkv_ref, ew_ref, wo_ref, bo_ref,
                     g_ref, beta_ref, o_ref):
    """Fused AFT-local attention for one M-row slab.

    x_ref    : [1, M, D_NORM]  f32   x_flatten(x)  (layout 'N L (H C)')
    wqkv_ref : [D_NORM, 3*D_MODEL] bf16  block-diag Wq|Wk|Wv (shared 1x1 convs)
    bqkv_ref : [1, 3*D_MODEL] f32
    ew_ref   : [M, M] bf16     exp(w_bias * local_mask) (block-diag if batches fused)
    wo_ref   : [D_MODEL, D_NORM] bf16  output Linear weight, [in, out] layout
    bo_ref   : [1, D_NORM] f32
    g_ref    : [1, D_NORM] f32   LayerNorm gamma
    beta_ref : [1, D_NORM] f32   LayerNorm beta
    o_ref    : [1, M, D_NORM] f32
    """
    x = x_ref[0]                                        # [M, D_NORM] f32 (residual)
    dm = wo_ref.shape[0]                                # D_MODEL (static)

    # Q, K, V for all heads in one lane-dense bf16 MXU push (f32 accumulate).
    qkv = jnp.dot(x.astype(jnp.bfloat16), wqkv_ref[...],
                  preferred_element_type=jnp.float32) + bqkv_ref[...]
    q = qkv[:, 0 * dm:1 * dm]                           # [M, D_MODEL] f32
    k = qkv[:, 1 * dm:2 * dm]
    v = qkv[:, 2 * dm:3 * dm]

    # sigmoid via EUP exp + EUP approximate reciprocal (keeps VALU free).
    q_sig = pl.reciprocal(1.0 + jnp.exp(-q), approx=True)
    ek = jnp.exp(k)                                     # [M, D_MODEL] f32

    # Fused num/den aggregation: ONE [M,M] x [M, 2*D_MODEL] bf16 matmul.
    ekv = jnp.concatenate([ek * v, ek], axis=-1).astype(jnp.bfloat16)
    agg = jnp.dot(ew_ref[...], ekv, preferred_element_type=jnp.float32)
    num = agg[:, :dm]
    den = agg[:, dm:]

    # EUP approximate reciprocal + one Newton refinement (2 VPU ops, ~free).
    recip = pl.reciprocal(den, approx=True)
    recip = recip * (2.0 - den * recip)
    r = q_sig * num * recip                             # [M, D_MODEL] f32

    out = jnp.dot(r.astype(jnp.bfloat16), wo_ref[...],
                  preferred_element_type=jnp.float32) + bo_ref[...]
    res = out + x                                       # residual with f32 x_flatten(x)

    # Single-pass LayerNorm: var = E[x^2] - mu^2.
    mu = jnp.mean(res, axis=-1, keepdims=True)
    ms = jnp.mean(res * res, axis=-1, keepdims=True)
    var = ms - mu * mu
    o_ref[0] = (res - mu) * jax.lax.rsqrt(var + EPS) * g_ref[...] + beta_ref[...]


# ----------------------------- host-side helpers ----------------------------
def _block_diag(w_t, n_head):
    """w_t: [C_in, C_out] shared per-head weight -> [H*C_in, H*C_out] block diag."""
    c_in, c_out = w_t.shape
    eye = jnp.eye(n_head, dtype=w_t.dtype)
    return jnp.einsum("hg,cj->hcgj", eye, w_t).reshape(n_head * c_in,
                                                       n_head * c_out)


def _flatten_NCLH(t):
    """Rearrange('N C L H -> N L (H C)')."""
    n, c, l, h = t.shape
    return jnp.transpose(t, (0, 2, 3, 1)).reshape(n, l, h * c)


def _tensorcores_per_chip():
    """Best-effort static detection of per-chip TensorCore count."""
    try:
        kind = jax.devices()[0].device_kind.lower()
    except Exception:  # pragma: no cover - fall back to safe single-TC path
        return 1
    if "v7" in kind or "7x" in kind:
        return 2
    if "v4" in kind or "v5p" in kind:
        return 2  # megacore parts
    return 1       # v5e / v6e: single TensorCore


# ----------------------------- host-side wrapper ----------------------------
def aft_local_attention(x, p):
    """x: [N, filters, L, n_head] -> score: [N, L, n_head*filters]."""
    nb, c, l, h = x.shape
    d_norm = h * c

    # x_flatten(x): matmul LHS and residual term (kept f32 for the residual).
    x_flat = _flatten_NCLH(x)                                     # [N, L, d_norm]

    # Shared 1x1-conv Q/K/V projections folded into one bf16 [d_norm, 3*d_model] RHS.
    w_qkv = jnp.concatenate(
        [_block_diag(p["wq"].T, h),
         _block_diag(p["wk"].T, h),
         _block_diag(p["wv"].T, h)], axis=1).astype(jnp.bfloat16)
    b_qkv = jnp.concatenate(
        [jnp.tile(p["bq"], h), jnp.tile(p["bk"], h), jnp.tile(p["bv"], h)])[None, :]

    # exp(w_bias * local_mask) precomputed on the host.
    ew = jnp.exp(p["w_bias"][:l, :l] * p["local_mask"][:l, :l].astype(jnp.float32))

    wo = p["out_w"].T.astype(jnp.bfloat16)                        # [d_model, d_norm]
    bo = p["out_b"][None, :]
    gamma = p["ln_g"][None, :]
    beta = p["ln_b"][None, :]

    if _tensorcores_per_chip() >= 2:
        # Multi-TC (v7x / megacore): one batch per TensorCore.
        g, m = nb, l
        x_g = x_flat                                              # [nb, l, d_norm]
        ew_g = ew.astype(jnp.bfloat16)                            # [l, l]
        dims = ("parallel",)
    else:
        # Single-TC (v5e / v6e): fuse both batches into one M = N*L slab.
        g, m = 1, nb * l
        x_g = x_flat.reshape(1, nb * l, d_norm)
        ew_g = jnp.kron(jnp.eye(nb, dtype=ew.dtype), ew).astype(jnp.bfloat16)
        dims = ("arbitrary",)

    def full_spec(a):
        nd = a.ndim
        return pl.BlockSpec(a.shape, lambda n, _nd=nd: (0,) * _nd)

    out = pl.pallas_call(
        aft_local_kernel,
        out_shape=jax.ShapeDtypeStruct((g, m, d_norm), jnp.float32),
        grid=(g,),
        in_specs=[
            pl.BlockSpec((1, m, d_norm), lambda n: (n, 0, 0)),
            full_spec(w_qkv), full_spec(b_qkv), full_spec(ew_g),
            full_spec(wo), full_spec(bo), full_spec(gamma), full_spec(beta),
        ],
        out_specs=pl.BlockSpec((1, m, d_norm), lambda n: (n, 0, 0)),
        compiler_params=pltpu.CompilerParams(dimension_semantics=dims),
    )(x_g, w_qkv, b_qkv, ew_g, wo, bo, gamma, beta)

    return out.reshape(nb, l, d_norm)


# ----------------------------- pure-JAX reference ---------------------------
def aft_local_reference(x, p):
    nb, c, l, h = x.shape

    def conv1x1_flat(w, b):
        y = jnp.einsum("nclh,oc->nolh", x, w) + b[None, :, None, None]
        return _flatten_NCLH(y)

    q = conv1x1_flat(p["wq"], p["bq"])
    k = conv1x1_flat(p["wk"], p["bk"])
    v = conv1x1_flat(p["wv"], p["bv"])

    wb = p["w_bias"][:l, :l] * p["local_mask"][:l, :l].astype(jnp.float32)
    ew = jnp.exp(wb)
    q_sig = jax.nn.sigmoid(q)
    num = jnp.einsum("ij,njd->nid", ew, jnp.exp(k) * v)
    den = jnp.einsum("ij,njd->nid", ew, jnp.exp(k))
    r = q_sig * (num / den)

    out = jnp.einsum("nld,od->nlo", r, p["out_w"]) + p["out_b"]
    res = out + _flatten_NCLH(x)
    mu = jnp.mean(res, axis=-1, keepdims=True)
    var = jnp.mean(jnp.square(res - mu), axis=-1, keepdims=True)
    return (res - mu) / jnp.sqrt(var + EPS) * p["ln_g"] + p["ln_b"]


# ----------------------------- parameters -----------------------------------
def get_local_mask(seq_len, local_window_size):
    i = jnp.arange(seq_len)[:, None]
    j = jnp.arange(seq_len)[None, :]
    return (j - i <= local_window_size - 1) & (i - j <= local_window_size - 1)


def init_params(key):
    ks = jax.random.split(key, 9)

    def nrm(k, shape, scale=0.1):
        return scale * jax.random.normal(k, shape, dtype=jnp.float32)

    limit = math.sqrt(6.0 / (SEQ_LEN + SEQ_LEN))      # xavier_uniform for w_bias
    return dict(
        wq=nrm(ks[0], (D_QKV, FILTERS)), bq=nrm(ks[1], (D_QKV,)),
        wk=nrm(ks[2], (D_QKV, FILTERS)), bk=nrm(ks[3], (D_QKV,)),
        wv=nrm(ks[4], (D_QKV, FILTERS)), bv=nrm(ks[5], (D_QKV,)),
        w_bias=jax.random.uniform(ks[6], (SEQ_LEN, SEQ_LEN),
                                  jnp.float32, -limit, limit),
        local_mask=get_local_mask(SEQ_LEN, LOCAL_WINDOW),
        out_w=nrm(ks[7], (D_NORM, D_MODEL)),          # torch Linear layout [out, in]
        out_b=nrm(ks[8], (D_NORM,)),
        ln_g=jnp.ones((D_NORM,), jnp.float32),
        ln_b=jnp.zeros((D_NORM,), jnp.float32),
    )


# ----------------------------------- main ------------------------------------
if __name__ == "__main__":
    key = jax.random.PRNGKey(0)
    k_in, k_par = jax.random.split(key)

    x = jax.random.normal(k_in, (N, FILTERS, SEQ_LEN, N_HEAD), dtype=jnp.float32)
    params = init_params(k_par)

    fwd = jax.jit(aft_local_attention)
    out = jax.block_until_ready(fwd(x, params))

    assert out.shape == (N, SEQ_LEN, D_NORM), out.shape
    assert bool(jnp.all(jnp.isfinite(out)))

    ref = aft_local_reference(x, params)
    max_err = float(jnp.max(jnp.abs(out - ref)))
    # tolerance accounts for bf16 MXU operands + EUP approximate reciprocals
    assert max_err < 5e-2, f"max abs err vs reference = {max_err}"

    print("KERNEL_OK")
</pallas_src>

<mosaic_0001>
module attributes {stable_mosaic.version = 11 : i64} {
  func.func @aft_local_kernel(%arg0: i32, %arg1: memref<1x64x128xf32, #tpu.memory_space<vmem>>, %arg2: memref<128x384xbf16, #tpu.memory_space<vmem>>, %arg3: memref<1x384xf32, #tpu.memory_space<vmem>>, %arg4: memref<64x64xbf16, #tpu.memory_space<vmem>>, %arg5: memref<128x128xbf16, #tpu.memory_space<vmem>>, %arg6: memref<1x128xf32, #tpu.memory_space<vmem>>, %arg7: memref<1x128xf32, #tpu.memory_space<vmem>>, %arg8: memref<1x128xf32, #tpu.memory_space<vmem>>, %arg9: memref<1x64x128xf32, #tpu.memory_space<vmem>>) attributes {dimension_semantics = [#tpu.dimension_semantics<arbitrary>], iteration_bounds = array<i64: 1>, scalar_prefetch = 0 : i64, scratch_operands = 0 : i64, tpu.core_type = #tpu.core_type<tc>, window_params = [{transform_indices = @transform_0, window_bounds = array<i64: 1, 64, 128>}, {pipeline_mode = #tpu.pipeline_mode<synchronous>, transform_indices = @transform_1, window_bounds = array<i64: 128, 384>}, {pipeline_mode = #tpu.pipeline_mode<synchronous>, transform_indices = @transform_2, window_bounds = array<i64: 1, 384>}, {pipeline_mode = #tpu.pipeline_mode<synchronous>, transform_indices = @transform_3, window_bounds = array<i64: 64, 64>}, {pipeline_mode = #tpu.pipeline_mode<synchronous>, transform_indices = @transform_4, window_bounds = array<i64: 128, 128>}, {pipeline_mode = #tpu.pipeline_mode<synchronous>, transform_indices = @transform_5, window_bounds = array<i64: 1, 128>}, {pipeline_mode = #tpu.pipeline_mode<synchronous>, transform_indices = @transform_6, window_bounds = array<i64: 1, 128>}, {pipeline_mode = #tpu.pipeline_mode<synchronous>, transform_indices = @transform_7, window_bounds = array<i64: 1, 128>}, {transform_indices = @transform_8, window_bounds = array<i64: 1, 64, 128>}]} {
    %c0 = arith.constant 0 : index
    %c0_0 = arith.constant 0 : index
    %c0_1 = arith.constant 0 : index
    %0 = vector.load %arg1[%c0, %c0_0, %c0_1] : memref<1x64x128xf32, #tpu.memory_space<vmem>>, vector<1x64x128xf32>
    %1 = vector.shape_cast %0 : vector<1x64x128xf32> to vector<64x128xf32>
    %2 = arith.truncf %1 : vector<64x128xf32> to vector<64x128xbf16>
    %c0_2 = arith.constant 0 : index
    %c0_3 = arith.constant 0 : index
    %3 = vector.load %arg2[%c0_2, %c0_3] : memref<128x384xbf16, #tpu.memory_space<vmem>>, vector<128x384xbf16>
    %cst = arith.constant dense<0.000000e+00> : vector<64x384xf32>
    %4 = tpu.matmul %2, %3, %cst {dimension_numbers = #tpu.dot_dimension_numbers<[1], [0], [0], [1], [0, 0, 1, 1], [], []>} : vector<64x128xbf16>, vector<128x384xbf16>, vector<64x384xf32> -> vector<64x384xf32>
    %c0_4 = arith.constant 0 : index
    %c0_5 = arith.constant 0 : index
    %5 = vector.load %arg3[%c0_4, %c0_5] : memref<1x384xf32, #tpu.memory_space<vmem>>, vector<1x384xf32>
    %6 = vector.broadcast %5 : vector<1x384xf32> to vector<64x384xf32>
    %7 = arith.addf %4, %6 : vector<64x384xf32>
    %8 = vector.extract_strided_slice %7 {offsets = [0, 0], sizes = [64, 128], strides = [1, 1]} : vector<64x384xf32> to vector<64x128xf32>
    %9 = vector.extract_strided_slice %7 {offsets = [0, 128], sizes = [64, 128], strides = [1, 1]} : vector<64x384xf32> to vector<64x128xf32>
    %10 = vector.extract_strided_slice %7 {offsets = [0, 256], sizes = [64, 128], strides = [1, 1]} : vector<64x384xf32> to vector<64x128xf32>
    %cst_6 = arith.constant 0.000000e+00 : f32
    %11 = vector.broadcast %cst_6 : f32 to vector<64x128xf32>
    %12 = arith.subf %11, %8 : vector<64x128xf32>
    %13 = math.exp %12 : vector<64x128xf32>
    %cst_7 = arith.constant 1.000000e+00 : f32
    %14 = vector.broadcast %cst_7 : f32 to vector<64x128xf32>
    %15 = arith.addf %14, %13 : vector<64x128xf32>
    %16 = tpu.reciprocal %15 {approx = true} : vector<64x128xf32> -> vector<64x128xf32>
    %17 = math.exp %9 : vector<64x128xf32>
    %18 = arith.mulf %17, %10 : vector<64x128xf32>
    %19 = tpu.concatenate %18, %17 in 1 : vector<64x128xf32>, vector<64x128xf32> -> vector<64x256xf32>
    %20 = arith.truncf %19 : vector<64x256xf32> to vector<64x256xbf16>
    %c0_8 = arith.constant 0 : index
    %c0_9 = arith.constant 0 : index
    %21 = vector.load %arg4[%c0_8, %c0_9] : memref<64x64xbf16, #tpu.memory_space<vmem>>, vector<64x64xbf16>
    %cst_10 = arith.constant dense<0.000000e+00> : vector<64x256xf32>
    %22 = tpu.matmul %21, %20, %cst_10 {dimension_numbers = #tpu.dot_dimension_numbers<[1], [0], [0], [1], [0, 0, 1, 1], [], []>} : vector<64x64xbf16>, vector<64x256xbf16>, vector<64x256xf32> -> vector<64x256xf32>
    %23 = vector.extract_strided_slice %22 {offsets = [0, 0], sizes = [64, 128], strides = [1, 1]} : vector<64x256xf32> to vector<64x128xf32>
    %24 = vector.extract_strided_slice %22 {offsets = [0, 128], sizes = [64, 128], strides = [1, 1]} : vector<64x256xf32> to vector<64x128xf32>
    %25 = tpu.reciprocal %24 {approx = true} : vector<64x128xf32> -> vector<64x128xf32>
    %26 = arith.mulf %24, %25 : vector<64x128xf32>
    %cst_11 = arith.constant 2.000000e+00 : f32
    %27 = vector.broadcast %cst_11 : f32 to vector<64x128xf32>
    %28 = arith.subf %27, %26 : vector<64x128xf32>
    %29 = arith.mulf %25, %28 : vector<64x128xf32>
    %30 = arith.mulf %16, %23 : vector<64x128xf32>
    %31 = arith.mulf %30, %29 : vector<64x128xf32>
    %32 = arith.truncf %31 : vector<64x128xf32> to vector<64x128xbf16>
    %c0_12 = arith.constant 0 : index
    %c0_13 = arith.constant 0 : index
    %33 = vector.load %arg5[%c0_12, %c0_13] : memref<128x128xbf16, #tpu.memory_space<vmem>>, vector<128x128xbf16>
    %cst_14 = arith.constant dense<0.000000e+00> : vector<64x128xf32>
    %34 = tpu.matmul %32, %33, %cst_14 {dimension_numbers = #tpu.dot_dimension_numbers<[1], [0], [0], [1], [0, 0, 1, 1], [], []>} : vector<64x128xbf16>, vector<128x128xbf16>, vector<64x128xf32> -> vector<64x128xf32>
    %c0_15 = arith.constant 0 : index
    %c0_16 = arith.constant 0 : index
    %35 = vector.load %arg6[%c0_15, %c0_16] : memref<1x128xf32, #tpu.memory_space<vmem>>, vector<1x128xf32>
    %36 = vector.broadcast %35 : vector<1x128xf32> to vector<64x128xf32>
    %37 = arith.addf %34, %36 : vector<64x128xf32>
    %38 = arith.addf %37, %1 : vector<64x128xf32>
    %cst_17 = arith.constant dense<0.000000e+00> : vector<64xf32>
    %39 = vector.multi_reduction <add>, %38, %cst_17 [1] : vector<64x128xf32> to vector<64xf32>
    %40 = vector.shape_cast %39 : vector<64xf32> to vector<64x1xf32>
    %cst_18 = arith.constant 1.280000e+02 : f32
    %41 = vector.broadcast %cst_18 : f32 to vector<64x1xf32>
    %42 = arith.divf %40, %41 : vector<64x1xf32>
    %43 = arith.mulf %38, %38 : vector<64x128xf32>
    %cst_19 = arith.constant dense<0.000000e+00> : vector<64xf32>
    %44 = vector.multi_reduction <add>, %43, %cst_19 [1] : vector<64x128xf32> to vector<64xf32>
    %45 = vector.shape_cast %44 : vector<64xf32> to vector<64x1xf32>
    %cst_20 = arith.constant 1.280000e+02 : f32
    %46 = vector.broadcast %cst_20 : f32 to vector<64x1xf32>
    %47 = arith.divf %45, %46 : vector<64x1xf32>
    %48 = arith.mulf %42, %42 : vector<64x1xf32>
    %49 = arith.subf %47, %48 : vector<64x1xf32>
    %50 = vector.broadcast %42 : vector<64x1xf32> to vector<64x128xf32>
    %51 = arith.subf %38, %50 : vector<64x128xf32>
    %cst_21 = arith.constant 9.99999974E-6 : f32
    %52 = vector.broadcast %cst_21 : f32 to vector<64x1xf32>
    %53 = arith.addf %49, %52 : vector<64x1xf32>
    %54 = math.rsqrt %53 : vector<64x1xf32>
    %55 = vector.broadcast %54 : vector<64x1xf32> to vector<64x128xf32>
    %56 = arith.mulf %51, %55 : vector<64x128xf32>
    %c0_22 = arith.constant 0 : index
    %c0_23 = arith.constant 0 : index
    %57 = vector.load %arg7[%c0_22, %c0_23] : memref<1x128xf32, #tpu.memory_space<vmem>>, vector<1x128xf32>
    %58 = vector.broadcast %57 : vector<1x128xf32> to vector<64x128xf32>
    %59 = arith.mulf %56, %58 : vector<64x128xf32>
    %c0_24 = arith.constant 0 : index
    %c0_25 = arith.constant 0 : index
    %60 = vector.load %arg8[%c0_24, %c0_25] : memref<1x128xf32, #tpu.memory_space<vmem>>, vector<1x128xf32>
    %61 = vector.broadcast %60 : vector<1x128xf32> to vector<64x128xf32>
    %62 = arith.addf %59, %61 : vector<64x128xf32>
    %c0_26 = arith.constant 0 : index
    %c0_27 = arith.constant 0 : index
    %c0_28 = arith.constant 0 : index
    %63 = vector.load %arg9[%c0_26, %c0_27, %c0_28] : memref<1x64x128xf32, #tpu.memory_space<vmem>>, vector<1x64x128xf32>
    %64 = vector.shape_cast %63 : vector<1x64x128xf32> to vector<64x128xf32>
    %65 = vector.shape_cast %62 : vector<64x128xf32> to vector<1x64x128xf32>
    tpu.vector_store %arg9[%c0_26, %c0_27, %c0_28], %65 {strides = array<i32>} : memref<1x64x128xf32, #tpu.memory_space<vmem>>, vector<1x64x128xf32>,
    return
  }
  func.func @transform_0(%arg0: i32) -> (i32, i32, i32) {
    %c0_i32 = arith.constant 0 : i32
    %c0_i32_0 = arith.constant 0 : i32
    %c0_i32_1 = arith.constant 0 : i32
    return %arg0, %c0_i32, %c0_i32_0 : i32, i32, i32
  }
  func.func @transform_1(%arg0: i32) -> (i32, i32) {
    %c0_i32 = arith.constant 0 : i32
    %c0_i32_0 = arith.constant 0 : i32
    %c0_i32_1 = arith.constant 0 : i32
    return %c0_i32, %c0_i32_0 : i32, i32
  }
  func.func @transform_2(%arg0: i32) -> (i32, i32) {
    %c0_i32 = arith.constant 0 : i32
    %c0_i32_0 = arith.constant 0 : i32
    %c0_i32_1 = arith.constant 0 : i32
    return %c0_i32, %c0_i32_0 : i32, i32
  }
  func.func @transform_3(%arg0: i32) -> (i32, i32) {
    %c0_i32 = arith.constant 0 : i32
    %c0_i32_0 = arith.constant 0 : i32
    %c0_i32_1 = arith.constant 0 : i32
    return %c0_i32, %c0_i32_0 : i32, i32
  }
  func.func @transform_4(%arg0: i32) -> (i32, i32) {
    %c0_i32 = arith.constant 0 : i32
    %c0_i32_0 = arith.constant 0 : i32
    %c0_i32_1 = arith.constant 0 : i32
    return %c0_i32, %c0_i32_0 : i32, i32
  }
  func.func @transform_5(%arg0: i32) -> (i32, i32) {
    %c0_i32 = arith.constant 0 : i32
    %c0_i32_0 = arith.constant 0 : i32
    %c0_i32_1 = arith.constant 0 : i32
    return %c0_i32, %c0_i32_0 : i32, i32
  }
  func.func @transform_6(%arg0: i32) -> (i32, i32) {
    %c0_i32 = arith.constant 0 : i32
    %c0_i32_0 = arith.constant 0 : i32
    %c0_i32_1 = arith.constant 0 : i32
    return %c0_i32, %c0_i32_0 : i32, i32
  }
  func.func @transform_7(%arg0: i32) -> (i32, i32) {
    %c0_i32 = arith.constant 0 : i32
    %c0_i32_0 = arith.constant 0 : i32
    %c0_i32_1 = arith.constant 0 : i32
    return %c0_i32, %c0_i32_0 : i32, i32
  }
  func.func @transform_8(%arg0: i32) -> (i32, i32, i32) {
    %c0_i32 = arith.constant 0 : i32
    %c0_i32_0 = arith.constant 0 : i32
    %c0_i32_1 = arith.constant 0 : i32
    return %arg0, %c0_i32, %c0_i32_0 : i32, i32, i32
  }
}

</mosaic_0001>

<bundles_post_ra>
// kernel: tile.18
= control target key start
LH: loop header
LB: loop body
LE: loop exit
PB: predicated region body
PF: predicated region fallthrough
CT: control target
= control target key end

     0   :  { %s22_s0 = inlined_call_operand.vmem [shape: f32[16], index: 0, kind: input, shape index: {}]   ;;  %s23_s1 = inlined_call_operand.vmem [shape: f32[8,16], index: 1, kind: output, shape index: {}]  }
   0x1   :  { %v4_v0 = vld [vmem:[%s22_s0] ss:$0 sm:$0xff] }
   0x2   :  { %5 = vst [vmem:[%s23_s1] sm:$0xff] %v4_v0 }

// kernel: tile.19
= control target key start
LH: loop header
LB: loop body
LE: loop exit
PB: predicated region body
PF: predicated region fallthrough
CT: control target
= control target key end

     0   :  { %s67_s10 = smov 112   ;;  %s68_s11 = smov 80   ;;  %vm3_vm0 = vcmask 130048   ;;  %vm9_vm1 = vcmask 1048448   ;;  %vm15_vm2 = vcmask 917248   ;;  %vm21_vm3 = vcmask 786048   ;;  %s111_s0 = inlined_call_operand.vmem [shape: f32[8,16], index: 0, kind: input, shape index: {}]   ;;  %s112_s1 = inlined_call_operand.vmem [shape: f32[128], index: 1, kind: output, shape index: {}]  }
   0x1   :  { %v53_v0 = vld [vmem:[%s111_s0 + $0x7] sm:$0x1]   ;;  %v55_v1 = vld [vmem:[%s111_s0 + $0x5] sm:$0x1]   ;;  %v54_v2 = vld [vmem:[%s111_s0 + $0x6] sm:$0x1]  }
   0x2   :  { %7 = vrot.lane.b32.xlu0 %v53_v0, %s67_s10  ;;  %19 = vrot.lane.b32.xlu1 %v55_v1, %s68_s11  ;;  %v56_v3 = vld [vmem:[%s111_s0 + $0x4] sm:$0x1]   ;;  %v2_v4 = vld [vmem:[%s111_s0] sm:$0x1]   ;;  %s69_s18 = smov 96   ;;  %s70_s19 = smov 64  }
   0x3   :  { %4 = vst.msk [vmem:[#allocation0] sm:$0x1] %vm3_vm0, %v2_v4   ;;  %v57_v5 = vld [vmem:[%s111_s0 + $0x3] sm:$0x1]   ;;  %v58_v6 = vld [vmem:[%s111_s0 + $0x2] sm:$0x1]  }
   0x4   :  { %s71_s24 = smov 48   ;;  %s72_s25 = smov 32   ;;  %v59_v7 = vld [vmem:[%s111_s0 + $0x1] sm:$0x1]   ;;  %vm27_vm4 = vcmask 654848   ;;  %vm33_vm5 = vcmask 523648  }
   0x5   :  { %s73_s0 = smov 16   ;;  %vm39_vm6 = vcmask 392448   ;;  %vm45_vm7 = vcmask 261248  }
   0x6   :  { %13 = vrot.lane.b32.xlu0 %v54_v2, %s69_s18  ;;  %25 = vrot.lane.b32.xlu1 %v56_v3, %s70_s19 }
   0xa   :  { %31 = vrot.lane.b32.xlu0 %v57_v5, %s71_s24  ;;  %37 = vrot.lane.b32.xlu1 %v58_v6, %s72_s25 }
   0xe   :  { %43 = vrot.lane.b32.xlu0 %v59_v7, %s73_s0 }
  0x74   :  { %v8_v8 = vpop.permute.xlu0 %7   ;;  %v20_v9 = vpop.permute.xlu1 %19  }
  0x75   :  { %10 = vst.msk [vmem:[#allocation0] sm:$0x1] %vm9_vm1, %v8_v8  }
  0x78   :  { %v14_v10 = vpop.permute.xlu0 %13   ;;  %v26_v11 = vpop.permute.xlu1 %25  }
  0x79   :  { %16 = vst.msk [vmem:[#allocation0] sm:$0x1] %vm15_vm2, %v14_v10  }
  0x7a   :  { %22 = vst.msk [vmem:[#allocation0] sm:$0x1] %vm21_vm3, %v20_v9  }
  0x7b   :  { %28 = vst.msk [vmem:[#allocation0] sm:$0x1] %vm27_vm4, %v26_v11  }
  0x7c   :  { %v32_v12 = vpop.permute.xlu0 %31   ;;  %v38_v13 = vpop.permute.xlu1 %37  }
  0x7d   :  { %34 = vst.msk [vmem:[#allocation0] sm:$0x1] %vm33_vm5, %v32_v12  }
  0x7e   :  { %40 = vst.msk [vmem:[#allocation0] sm:$0x1] %vm39_vm6, %v38_v13  }
  0x80   :  { %v44_v14 = vpop.permute.xlu0 %43  }
  0x81   :  { %46 = vst.msk [vmem:[#allocation0] sm:$0x1] %vm45_vm7, %v44_v14  }
  0x88   :  { %v50_v15 = vld [vmem:[#allocation0] sm:$0x1] }
  0x89   :  { %52 = vst [vmem:[%s112_s1] sm:$0x1] %v50_v15 }

// kernel: aft_local_attention.1
= control target key start
LH: loop header
LB: loop body
LE: loop exit
PB: predicated region body
PF: predicated region fallthrough
CT: control target
= control target key end

     0   :  { %v1166_v2 = vmov 0   ;;  %s1533_s0 = inlined_call_operand.vmem [shape: f32[1,64,128], index: 0, kind: input, shape index: {}]   ;;  %s1534_s1 = inlined_call_operand.vmem [shape: bf16[128,384], index: 1, kind: input, shape index: {}]   ;;  %s1535_s2 = inlined_call_operand.vmem [shape: f32[1,384], index: 2, kind: input, shape index: {}]   ;;  %s1536_s3 = inlined_call_operand.vmem [shape: bf16[64,64], index: 3, kind: input, shape index: {}]   ;;  %s1537_s4 = inlined_call_operand.vmem [shape: bf16[128,128], index: 4, kind: input, shape index: {}]   ;;  %s1538_s5 = inlined_call_operand.vmem [shape: f32[1,128], index: 5, kind: input, shape index: {}]   ;;  %s1539_s6 = inlined_call_operand.vmem [shape: f32[1,128], index: 6, kind: input, shape index: {}]   ;;  %s1540_s7 = inlined_call_operand.vmem [shape: f32[1,128], index: 7, kind: input, shape index: {}]   ;;  %s1541_s8 = inlined_call_operand.hbm [shape: f32[1,64,128], index: 8, kind: output, shape index: {}]  }
   0x1   :  { %v1018_v0 = vld [vmem:[%s1534_s1 + $0x4] ss:$12 sps:$4 sm:$0xff]   ;;  %v1020_v1 = vld [vmem:[%s1534_s1] ss:$12 sps:$4 sm:$0xff]   ;;  %252 = vmatprep.mubr.bf16.mxu0 %v1166_v2  ;;  %v1021_v3 = vld [vmem:[%s1534_s1 + $0x1c] ss:$12 sps:$4 sm:$0xff]  }
   0x2   :  { %220 = vmatprep.subr.bf16.mxu0 %v1018_v0  ;;  %v1023_v4 = vld [vmem:[%s1534_s1 + $0x18] ss:$12 sps:$4 sm:$0xff]   ;;  %v1024_v5 = vld [vmem:[%s1534_s1 + $0x34] ss:$12 sps:$4 sm:$0xff]   ;;  %v1026_v7 = vld [vmem:[%s1534_s1 + $0x30] ss:$12 sps:$4 sm:$0xff]  }
   0x3   :  { %221 = vmatpush1.bf16.msra.mxu0 %v1020_v1  ;;  %v1030_v6 = vld [vmem:[%s1534_s1 + $0x8] ss:$12 sps:$4 sm:$0xff]   ;;  %v1027_v8 = vld [vmem:[%s1534_s1 + $0x4c] ss:$12 sps:$4 sm:$0xff]   ;;  %v1031_v12 = vld [vmem:[%s1534_s1 + $0x64] ss:$12 sps:$4 sm:$0xff]  }
   0x4   :  { %222 = vmatprep.subr.bf16.mxu0 %v1021_v3  ;;  %966 = vmatprep.subr.bf16.mxu1 %v1030_v6  ;;  %v1034_v9 = vld [vmem:[%s1534_s1 + $0x20] ss:$12 sps:$4 sm:$0xff]   ;;  %v1038_v10 = vld [vmem:[%s1534_s1 + $0x38] ss:$12 sps:$4 sm:$0xff]   ;;  %v1029_v11 = vld [vmem:[%s1534_s1 + $0x48] ss:$12 sps:$4 sm:$0xff]  }
   0x5   :  { %967 = vmatpush3.bf16.msra.mxu1 %v1030_v6  ;;  %v1033_v13 = vld [vmem:[%s1534_s1 + $0x60] ss:$12 sps:$4 sm:$0xff]   ;;  %v1042_v14 = vld [vmem:[%s1534_s1 + $0x50] ss:$12 sps:$4 sm:$0xff]   ;;  %v1046_v19 = vld [vmem:[%s1534_s1 + $0x68] ss:$12 sps:$4 sm:$0xff]  }
   0x6   :  { %968 = vmatprep.subr.bf16.mxu1 %v1034_v9  ;;  %v1035_v15 = vld [vmem:[%s1534_s1 + $0x7c] ss:$12 sps:$4 sm:$0xff]   ;;  %v1264_v16 = vld [vmem:[%s1533_s0] sm:$0xff]  ;;  %v1043_v24 = vld [vmem:[%s1534_s1 + $0xac] ss:$12 sps:$4 sm:$0xff]  }
   0x7   :  { %223 = vmatpush1.bf16.msra.mxu0 %v1023_v4  ;;  %v1269_v17 = vld [vmem:[%s1533_s0 + $0x8] sm:$0xff]  ;;  %v1037_v20 = vld [vmem:[%s1534_s1 + $0x78] ss:$12 sps:$4 sm:$0xff]   ;;  %v1039_v21 = vld [vmem:[%s1534_s1 + $0x94] ss:$12 sps:$4 sm:$0xff]  }
   0x8   :  { %224 = vmatprep.subr.bf16.mxu0 %v1024_v5  ;;  %v39_v18 = vpack.c.bf16 %v1269_v17, %v1264_v16  ;;  %v1041_v22 = vld [vmem:[%s1534_s1 + $0x90] ss:$12 sps:$4 sm:$0xff]   ;;  %v1047_v23 = vld [vmem:[%s1534_s1 + $0x80] ss:$12 sps:$4 sm:$0xff]   ;;  %v1048_v25 = vld [vmem:[%s1534_s1 + $0x98] ss:$12 sps:$4 sm:$0xff]  }
   0x9   :  { %969 = vmatpush3.bf16.msra.mxu1 %v1034_v9  ;;  %v1045_v26 = vld [vmem:[%s1534_s1 + $0xa8] ss:$12 sps:$4 sm:$0xff]  }
   0xa   :  { %970 = vmatprep.subr.bf16.mxu1 %v1038_v10  ;;  %982 = vmatprep.mubr.bf16.mxu1 %v39_v18 }
   0xb   :  { %225 = vmatpush1.bf16.msra.mxu0 %v1026_v7 }
   0xc   :  { %226 = vmatprep.subr.bf16.mxu0 %v1027_v8 }
   0xd   :  { %971 = vmatpush3.bf16.msra.mxu1 %v1038_v10 }
   0xe   :  { %972 = vmatprep.subr.bf16.mxu1 %v1042_v14 }
   0xf   :  { %227 = vmatpush1.bf16.msra.mxu0 %v1029_v11 }
  0x10   :  { %228 = vmatprep.subr.bf16.mxu0 %v1031_v12 }
  0x11   :  { %973 = vmatpush3.bf16.msra.mxu1 %v1042_v14 }
  0x12   :  { %974 = vmatprep.subr.bf16.mxu1 %v1046_v19 }
  0x13   :  { %229 = vmatpush1.bf16.msra.mxu0 %v1033_v13 }
  0x14   :  { %230 = vmatprep.subr.bf16.mxu0 %v1035_v15 }
  0x15   :  { %975 = vmatpush3.bf16.msra.mxu1 %v1046_v19 }
  0x16   :  { %976 = vmatprep.subr.bf16.mxu1 %v1047_v23 }
  0x17   :  { %231 = vmatpush1.bf16.msra.mxu0 %v1037_v20 }
  0x18   :  { %232 = vmatprep.subr.bf16.mxu0 %v1039_v21 }
  0x19   :  { %977 = vmatpush3.bf16.msra.mxu1 %v1047_v23 }
  0x1b   :  { %233 = vmatpush1.bf16.msra.mxu0 %v1041_v22 }
  0x1c   :  { %234 = vmatprep.subr.bf16.mxu0 %v1043_v24 }
  0x1d   :  { %13 = vsyncpa [#allocation3], 0  ;;  %978 = vmatprep.subr.bf16.mxu1 %v1048_v25  ;;  %v1049_v27 = vld [vmem:[%s1534_s1 + $0xb0] ss:$12 sps:$4 sm:$0xff]   ;;  %v1314_v30 = vld [vmem:[%s1533_s0 + $0x20] sm:$0xff]  ;;  %v77_v37 = vlaneseq  ;;  %vm458_vm0 = vcmask 523264  }
  0x1e   :  { %979 = vmatpush3.bf16.msra.mxu1 %v1048_v25  ;;  %v1304_v28 = vld [vmem:[%s1533_s0 + $0x10] sm:$0xff]  ;;  %v1309_v29 = vld [vmem:[%s1533_s0 + $0x18] sm:$0xff]  ;;  %v1319_v31 = vld [vmem:[%s1533_s0 + $0x28] sm:$0xff] }
  0x1f   :  { %235 = vmatpush1.bf16.msra.mxu0 %v1045_v26  ;;  %980 = vmatprep.subr.bf16.mxu1 %v1049_v27  ;;  %v40_v32 = vpack.c.bf16 %v1309_v29, %v1304_v28  ;;  %v41_v33 = vpack.c.bf16 %v1319_v31, %v1314_v30  ;;  %v1329_v34 = vld [vmem:[%s1533_s0 + $0x30] sm:$0xff]  ;;  %v1334_v35 = vld [vmem:[%s1533_s0 + $0x38] sm:$0xff]  ;;  %v1340_v38 = vshrl.u32 %v77_v37, 7  ;;  %v1346_v40 = vld [vmem:[%s1535_s2] sm:$0x7] }
  0x20   :  { %v42_v36 = vpack.c.bf16 %v1334_v35, %v1329_v34 }
  0x21   :  { %v83_v39 = vsub.s32 1, %v1340_v38  ;;  %v87_v49 = vsub.s32 2, %v1340_v38 }
  0x22   :  { %253 = vmatmul.mubr.bf16.vlgmr.msra.gmra.mrb[0].mxu0 %v39_v18  ;;  %981 = vmatpush3.bf16.msra.mxu1 %v1049_v27 }
  0x23   :  { %262 = vmatprep.mubr.bf16.mxu0 %v1166_v2  ;;  %v1349_v41 = vrot.slane %v1346_v40, %v83_v39  ;;  %v1361_v56 = vrot.slane %v1346_v40, %v87_v49 }
  0x25   :  { %983 = vmatmul.mubr.bf16.vlgmr.msra.gmra.mrb[0].mxu1 %v40_v32 }
  0x26   :  { %986 = vmatprep.mubr.bf16.mxu1 %v41_v33 }
  0x2a   :  { %263 = vmatmul.mubr.bf16.gmra.mrb[4].mxu0 %v40_v32 }
  0x2b   :  { %272 = vmatprep.mubr.bf16.mxu0 %v1166_v2 }
  0x2d   :  { %987 = vmatmul.mubr.bf16.gmra.mrb[4].mxu1 %v42_v36 }
  0x2e   :  { %503 = vmatprep.mubr.bf16.mxu1 %v1166_v2 }
  0x32   :  { %273 = vmatmul.mubr.bf16.gmra.mrb[8].mxu0 %v41_v33 }
  0x33   :  { %282 = vmatprep.mubr.bf16.mxu0 %v1166_v2 }
  0x3a   :  { %283 = vmatmul.mubr.bf16.gmra.mrb[12].mxu0 %v42_v36 }
  0xf5   :  { %v1351_v42 = vpop.f32.mrb[0].mxu0 }
  0xf6   :  { %v256_v43 = vpop.f32.mrb[1].mxu0 }
  0xf7   :  { %v257_v44 = vadd.f32 %v256_v43, %v1349_v41  ;;  %v1354_v45 = vpop.f32.mrb[2].mxu0 }
  0xf8   :  { %v260_v46 = vpop.f32.mrb[3].mxu0  ;;  %v984_v51 = vpop.f32.mrb[0].mxu1 }
  0xf9   :  { %v398_v47 = vmul.f32 1.442695, %v257_v44  ;;  %v261_v48 = vadd.f32 %v260_v46, %v1349_v41  ;;  %v327_v52 = vpop.f32.mrb[1].mxu1  ;;  %v336_v21 = vadd.f32 %v984_v51, %v1361_v56 }
  0xfa   :  { %v985_v54 = vpop.f32.mrb[2].mxu1  ;;  %v328_v63 = vadd.f32 %v327_v52, %v1361_v56 }
  0xfb   :  { %1062 = vpow2.f32 %v398_v47  ;;  %v400_v50 = vmul.f32 1.442695, %v261_v48  ;;  %v330_v57 = vpop.f32.mrb[3].mxu1  ;;  %v339_v24 = vadd.f32 %v985_v54, %v1361_v56 }
  0xfc   :  { %v331_v3 = vadd.f32 %v330_v57, %v1361_v56 }
  0xfd   :  { %1064 = vpow2.f32 %v400_v50  ;;  %v1358_v53 = vpop.f32.mrb[4].mxu0 }
  0xfe   :  { %v266_v55 = vpop.f32.mrb[5].mxu0 }
  0xff   :  { %v267_v58 = vadd.f32 %v266_v55, %v1349_v41  ;;  %v1364_v59 = vpop.f32.mrb[6].mxu0 }
 0x100   :  { %v270_v60 = vpop.f32.mrb[7].mxu0  ;;  %v988_v1 = vpop.f32.mrb[4].mxu1 }
 0x101   :  { %v402_v61 = vmul.f32 1.442695, %v267_v58  ;;  %v271_v62 = vadd.f32 %v270_v60, %v1349_v41  ;;  %v343_v4 = vpop.f32.mrb[5].mxu1 }
 0x102   :  { %v989_v7 = vpop.f32.mrb[6].mxu1  ;;  %v344_v50 = vadd.f32 %v343_v4, %v1361_v56 }
 0x103   :  { %1066 = vpow2.f32 %v402_v61  ;;  %v404_v0 = vmul.f32 1.442695, %v271_v62  ;;  %v346_v10 = vpop.f32.mrb[7].mxu1  ;;  %v352_v61 = vadd.f32 %v988_v1, %v1361_v56  ;;  %v1051_v1 = vld [vmem:[%s1536_s3 + $0x8] sm:$0xff]  }
 0x104   :  { %v347_v51 = vadd.f32 %v346_v10, %v1361_v56  ;;  %v1055_v10 = vld [vmem:[%s1537_s4 + $0x8] sm:$0xff]  }
 0x105   :  { %v1063_v5 = vpop.eup %1062  ;;  %1068 = vpow2.f32 %v404_v0  ;;  %v1369_v6 = vpop.f32.mrb[8].mxu0 }
 0x106   :  { %v414_v8 = vmul.f32 %v1063_v5, %v328_v63  ;;  %v276_v9 = vpop.f32.mrb[9].mxu0  ;;  %v355_v63 = vadd.f32 %v989_v7, %v1361_v56  ;;  %v1052_v56 = vld [vmem:[%s1536_s3 + $0x10] sm:$0xff]   ;;  %v1053_v7 = vld [vmem:[%s1536_s3 + $0x18] sm:$0xff]  }
 0x107   :  { %v1065_v11 = vpop.eup %1064  ;;  %v277_v12 = vadd.f32 %v276_v9, %v1349_v41  ;;  %v1372_v13 = vpop.f32.mrb[10].mxu0  ;;  %v1054_v9 = vld [vmem:[%s1537_s4] sm:$0xff]  }
 0x108   :  { %v415_v14 = vmul.f32 %v1065_v11, %v331_v3  ;;  %v280_v15 = vpop.f32.mrb[11].mxu0  ;;  %v423_v18 = vpack.c.bf16 %v1065_v11, %v1063_v5  ;;  %990 = vmatprep.subr.bf16.mxu0 %v1054_v9  ;;  %v1057_v11 = vld [vmem:[%s1537_s4 + $0x18] sm:$0xff]  }
 0x109   :  { %v406_v19 = vmul.f32 1.442695, %v277_v12  ;;  %v281_v20 = vadd.f32 %v280_v15, %v1349_v41  ;;  %991 = vmatpush3.bf16.msra.mxu0 %v1054_v9  ;;  %v1058_v12 = vld [vmem:[%s1537_s4 + $0x20] sm:$0xff]   ;;  %v1060_v15 = vld [vmem:[%s1537_s4 + $0x30] sm:$0xff]  }
 0x10a   :  { %v422_v22 = vpack.c.bf16 %v415_v14, %v414_v8  ;;  %471 = vmatprep.subr.bf16.mxu1 %v423_v18  ;;  %v1050_v8 = vld [vmem:[%s1536_s3] sm:$0xff]   ;;  %992 = vmatprep.subr.bf16.mxu0 %v1055_v10  ;;  %v1059_v14 = vld [vmem:[%s1537_s4 + $0x28] sm:$0xff]   ;;  %v1061_v18 = vld [vmem:[%s1537_s4 + $0x38] sm:$0xff]  }
 0x10b   :  { %v408_v23 = vmul.f32 1.442695, %v281_v20  ;;  %1070 = vpow2.f32 %v406_v19  ;;  %v79_v19 = vsub.s32 0, %v1340_v38 }
 0x10c   :  { %472 = vmatpush1.bf16.msra.mxu1 %v422_v22 }
 0x10d   :  { %v1067_v25 = vpop.eup %1066  ;;  %v1377_v26 = vpop.f32.mrb[12].mxu0  ;;  %1072 = vpow2.f32 %v408_v23  ;;  %993 = vmatpush3.bf16.msra.mxu0 %v1055_v10  ;;  %v80_v20 = vrot.slane %v1346_v40, %v79_v19 }
 0x10e   :  { %v416_v27 = vmul.f32 %v1067_v25, %v336_v21  ;;  %v286_v32 = vpop.f32.mrb[13].mxu0 }
 0x10f   :  { %v1069_v33 = vpop.eup %1068  ;;  %v287_v36 = vadd.f32 %v286_v32, %v1349_v41  ;;  %v1380_v37 = vpop.f32.mrb[14].mxu0  ;;  %v255_v21 = vadd.f32 %v1351_v42, %v80_v20  ;;  %v259_v22 = vadd.f32 %v1354_v45, %v80_v20  ;;  %v275_v38 = vadd.f32 %v1369_v6, %v80_v20 }
 0x110   :  { %v417_v39 = vmul.f32 %v1069_v33, %v339_v24  ;;  %v290_v43 = vpop.f32.mrb[15].mxu0  ;;  %v425_v44 = vpack.c.bf16 %v1069_v33, %v1067_v25  ;;  %v269_v33 = vadd.f32 %v1364_v59, %v80_v20  ;;  %v279_v42 = vadd.f32 %v1372_v13, %v80_v20 }
 0x111   :  { %v410_v46 = vmul.f32 1.442695, %v287_v36  ;;  %v291_v47 = vadd.f32 %v290_v43, %v1349_v41  ;;  %v358_v23 = vsub.f32 0.0, %v255_v21  ;;  %v359_v24 = vsub.f32 0.0, %v259_v22 }
 0x112   :  { %v424_v48 = vpack.c.bf16 %v417_v39, %v416_v27  ;;  %473 = vmatprep.subr.bf16.mxu1 %v425_v44  ;;  %v265_v27 = vadd.f32 %v1358_v53, %v80_v20  ;;  %v361_v39 = vsub.f32 0.0, %v269_v33  ;;  %v362_v45 = vsub.f32 0.0, %v275_v38 }
 0x113   :  { %v412_v49 = vmul.f32 1.442695, %v291_v47  ;;  %1074 = vpow2.f32 %v410_v46  ;;  %v366_v25 = vmul.f32 1.442695, %v358_v23  ;;  %v368_v32 = vmul.f32 1.442695, %v359_v24 }
 0x114   :  { %474 = vmatpush1.bf16.msra.mxu1 %v424_v48  ;;  %v360_v36 = vsub.f32 0.0, %v265_v27  ;;  %v372_v40 = vmul.f32 1.442695, %v361_v39  ;;  %v363_v46 = vsub.f32 0.0, %v279_v42  ;;  %v374_v53 = vmul.f32 1.442695, %v362_v45 }
 0x115   :  { %v1071_v52 = vpop.eup %1070  ;;  %1076 = vpow2.f32 %v412_v49  ;;  %v285_v48 = vadd.f32 %v1377_v26, %v80_v20 }
 0x116   :  { %v418_v54 = vmul.f32 %v1071_v52, %v344_v50  ;;  %1078 = vpow2.f32 %v366_v25  ;;  %v370_v43 = vmul.f32 1.442695, %v360_v36  ;;  %v376_v49 = vmul.f32 1.442695, %v363_v46 }
 0x117   :  { %v1073_v55 = vpop.eup %1072  ;;  %1080 = vpow2.f32 %v368_v32  ;;  %v289_v50 = vadd.f32 %v1380_v37, %v80_v20 }
 0x118   :  { %v419_v57 = vmul.f32 %v1073_v55, %v347_v51  ;;  %v427_v58 = vpack.c.bf16 %v1073_v55, %v1071_v52  ;;  %1082 = vpow2.f32 %v370_v43  ;;  %v364_v52 = vsub.f32 0.0, %v285_v48 }
 0x119   :  { %1084 = vpow2.f32 %v372_v40  ;;  %v365_v13 = vsub.f32 0.0, %v289_v50 }
 0x11a   :  { %v426_v60 = vpack.c.bf16 %v419_v57, %v418_v54  ;;  %475 = vmatprep.subr.bf16.mxu1 %v427_v58  ;;  %1086 = vpow2.f32 %v374_v53  ;;  %v378_v55 = vmul.f32 1.442695, %v364_v52 }
 0x11b   :  { %v380_v58 = vmul.f32 1.442695, %v365_v13 }
 0x11c   :  { %476 = vmatpush1.bf16.msra.mxu1 %v426_v60 }
 0x11d   :  { %v1075_v41 = vpop.eup %1074 }
 0x11e   :  { %v420_v62 = vmul.f32 %v1075_v41, %v352_v61 }
 0x11f   :  { %v1077_v0 = vpop.eup %1076 }
 0x120   :  { %v421_v3 = vmul.f32 %v1077_v0, %v355_v63  ;;  %v429_v4 = vpack.c.bf16 %v1077_v0, %v1075_v41  ;;  %v1079_v44 = vpop.eup %1078 }
 0x121   :  { %v1081_v47 = vpop.eup %1080  ;;  %v382_v59 = vadd.f32 1.0, %v1079_v44 }
 0x122   :  { %v428_v5 = vpack.c.bf16 %v421_v3, %v420_v62  ;;  %477 = vmatprep.subr.bf16.mxu1 %v429_v4  ;;  %v383_v51 = vadd.f32 1.0, %v1081_v47  ;;  %v1083_v6 = vpop.eup %1082 }
 0x123   :  { %1088 = vrcp.f32 %v382_v59  ;;  %v1085_v54 = vpop.eup %1084  ;;  %v384_v57 = vadd.f32 1.0, %v1083_v6 }
 0x124   :  { %478 = vmatpush1.bf16.msra.mxu1 %v428_v5  ;;  %1090 = vpow2.f32 %v376_v49  ;;  %v385_v60 = vadd.f32 1.0, %v1085_v54  ;;  %v1087_v26 = vpop.eup %1086 }
 0x125   :  { %1092 = vrcp.f32 %v383_v51  ;;  %v386_v3 = vadd.f32 1.0, %v1087_v26 }
 0x126   :  { %1094 = vpow2.f32 %v378_v55 }
 0x127   :  { %927 = vmatmul.mubr.msk.bf16.vlgmr.msra.gmra.mrb[8].mxu1 %vm458_vm0, %v1050_v8  ;;  %1096 = vrcp.f32 %v384_v57 }
 0x128   :  { %513 = vmatprep.mubr.bf16.mxu1 %v1166_v2  ;;  %1098 = vpow2.f32 %v380_v58 }
 0x129   :  { %1100 = vrcp.f32 %v385_v60 }
 0x12d   :  { %v1089_v61 = vpop.eup %1088 }
 0x12e   :  { %v1091_v41 = vpop.eup %1090 }
 0x12f   :  { %928 = vmatmul.mubr.msk.bf16.gmra.mrb[12].mxu1 %vm458_vm0, %v1051_v1  ;;  %v1093_v0 = vpop.eup %1092  ;;  %v387_v1 = vadd.f32 1.0, %v1091_v41 }
 0x130   :  { %523 = vmatprep.mubr.bf16.mxu1 %v1166_v2 }
 0x137   :  { %929 = vmatmul.mubr.msk.bf16.gmra.mrb[16].mxu1 %vm458_vm0, %v1052_v56  ;;  %v1095_v56 = vpop.eup %1094 }
 0x138   :  { %533 = vmatprep.mubr.bf16.mxu1 %v1166_v2  ;;  %v1056_v2 = vld [vmem:[%s1537_s4 + $0x10] sm:$0xff]  }
 0x139   :  { %994 = vmatprep.subr.bf16.mxu0 %v1056_v2 }
 0x13a   :  { %995 = vmatpush3.bf16.msra.mxu0 %v1056_v2 }
 0x13b   :  { %996 = vmatprep.subr.bf16.mxu0 %v1057_v11 }
 0x13e   :  { %997 = vmatpush3.bf16.msra.mxu0 %v1057_v11 }
 0x13f   :  { %930 = vmatmul.mubr.msk.bf16.gmra.mrb[20].mxu1 %vm458_vm0, %v1053_v7  ;;  %998 = vmatprep.subr.bf16.mxu0 %v1058_v12  ;;  %v1097_v7 = vpop.eup %1096 }
 0x140   :  { %v1099_v10 = vpop.eup %1098 }
 0x141   :  { %v389_v21 = vadd.f32 1.0, %v1099_v10 }
 0x142   :  { %999 = vmatpush3.bf16.msra.mxu0 %v1058_v12  ;;  %v1101_v12 = vpop.eup %1100 }
 0x143   :  { %1000 = vmatprep.subr.bf16.mxu0 %v1059_v14 }
 0x146   :  { %1001 = vmatpush3.bf16.msra.mxu0 %v1059_v14  ;;  %v388_v14 = vadd.f32 1.0, %v1095_v56 }
 0x147   :  { %1002 = vmatprep.subr.bf16.mxu0 %v1060_v15 }
 0x14a   :  { %1003 = vmatpush3.bf16.msra.mxu0 %v1060_v15 }
 0x14b   :  { %1004 = vmatprep.subr.bf16.mxu0 %v1061_v18 }
 0x14e   :  { %1005 = vmatpush3.bf16.msra.mxu0 %v1061_v18 }
 0x1fa   :  { %v505_v37 = vpop.f32.mrb[8].mxu1 }
 0x1fb   :  { %v576_v62 = vmul.f32 %v1089_v61, %v505_v37  ;;  %v507_v63 = vpop.f32.mrb[9].mxu1 }
 0x1fc   :  { %1102 = vrcp.f32 %v507_v63  ;;  %v509_v4 = vpop.f32.mrb[10].mxu1 }
 0x1fd   :  { %v577_v5 = vmul.f32 %v1093_v0, %v509_v4  ;;  %v511_v8 = vpop.f32.mrb[11].mxu1 }
 0x1fe   :  { %1104 = vrcp.f32 %v511_v8 }
 0x1ff   :  { %1106 = vrcp.f32 %v386_v3 }
 0x200   :  { %1108 = vrcp.f32 %v387_v1 }
 0x202   :  { %v515_v9 = vpop.f32.mrb[12].mxu1 }
 0x203   :  { %v578_v2 = vmul.f32 %v1097_v7, %v515_v9  ;;  %v517_v11 = vpop.f32.mrb[13].mxu1 }
 0x204   :  { %1110 = vrcp.f32 %v517_v11  ;;  %v519_v15 = vpop.f32.mrb[14].mxu1 }
 0x205   :  { %v579_v18 = vmul.f32 %v1101_v12, %v519_v15  ;;  %v521_v19 = vpop.f32.mrb[15].mxu1 }
 0x206   :  { %v1103_v20 = vpop.eup %1102  ;;  %1112 = vrcp.f32 %v521_v19 }
 0x207   :  { %v552_v22 = vmul.f32 %v1103_v20, %v507_v63  ;;  %1114 = vrcp.f32 %v388_v14 }
 0x208   :  { %v1105_v23 = vpop.eup %1104  ;;  %1116 = vrcp.f32 %v389_v21 }
 0x209   :  { %v560_v24 = vsub.f32 2.0, %v552_v22  ;;  %v553_v25 = vmul.f32 %v1105_v23, %v511_v8  ;;  %v1107_v27 = vpop.eup %1106 }
 0x20a   :  { %v525_v32 = vpop.f32.mrb[16].mxu1  ;;  %v1109_v38 = vpop.eup %1108 }
 0x20b   :  { %v568_v33 = vmul.f32 %v1103_v20, %v560_v24  ;;  %v561_v36 = vsub.f32 2.0, %v553_v25  ;;  %v580_v39 = vmul.f32 %v1107_v27, %v525_v32  ;;  %v527_v43 = vpop.f32.mrb[17].mxu1  ;;  %v931_v25 = vld [vmem:[%s1538_s5] ss:$0 sm:$0xff] }
 0x20c   :  { %1118 = vrcp.f32 %v527_v43  ;;  %v529_v40 = vpop.f32.mrb[18].mxu1 }
 0x20d   :  { %v569_v42 = vmul.f32 %v1105_v23, %v561_v36  ;;  %v581_v45 = vmul.f32 %v1109_v38, %v529_v40  ;;  %v531_v44 = vpop.f32.mrb[19].mxu1  ;;  %v584_v46 = vmul.f32 %v576_v62, %v568_v33 }
 0x20e   :  { %v1111_v47 = vpop.eup %1110  ;;  %1120 = vrcp.f32 %v531_v44 }
 0x20f   :  { %v554_v53 = vmul.f32 %v1111_v47, %v517_v11  ;;  %v585_v48 = vmul.f32 %v577_v5, %v569_v42 }
 0x210   :  { %v1113_v59 = vpop.eup %1112 }
 0x211   :  { %v562_v49 = vsub.f32 2.0, %v554_v53  ;;  %v555_v50 = vmul.f32 %v1113_v59, %v521_v19  ;;  %v592_v51 = vpack.c.bf16 %v585_v48, %v584_v46  ;;  %v1115_v52 = vpop.eup %1114 }
 0x212   :  { %v535_v6 = vpop.f32.mrb[20].mxu1  ;;  %v1117_v58 = vpop.eup %1116 }
 0x213   :  { %v570_v13 = vmul.f32 %v1111_v47, %v562_v49  ;;  %v563_v54 = vsub.f32 2.0, %v555_v50  ;;  %v582_v55 = vmul.f32 %v1115_v52, %v535_v6  ;;  %v537_v57 = vpop.f32.mrb[21].mxu1  ;;  %1006 = vmatprep.mubr.bf16.mxu0 %v592_v51 }
 0x214   :  { %1122 = vrcp.f32 %v537_v57  ;;  %v539_v60 = vpop.f32.mrb[22].mxu1 }
 0x215   :  { %v586_v26 = vmul.f32 %v578_v2, %v570_v13  ;;  %v571_v61 = vmul.f32 %v1113_v59, %v563_v54  ;;  %v583_v37 = vmul.f32 %v1117_v58, %v539_v60  ;;  %v541_v41 = vpop.f32.mrb[23].mxu1 }
 0x216   :  { %v1119_v62 = vpop.eup %1118  ;;  %1124 = vrcp.f32 %v541_v41 }
 0x217   :  { %v587_v63 = vmul.f32 %v579_v18, %v571_v61  ;;  %v556_v0 = vmul.f32 %v1119_v62, %v527_v43 }
 0x218   :  { %v1121_v3 = vpop.eup %1120 }
 0x219   :  { %v593_v4 = vpack.c.bf16 %v587_v63, %v586_v26  ;;  %v564_v5 = vsub.f32 2.0, %v556_v0  ;;  %v557_v8 = vmul.f32 %v1121_v3, %v531_v44 }
 0x21b   :  { %v572_v1 = vmul.f32 %v1119_v62, %v564_v5  ;;  %v565_v56 = vsub.f32 2.0, %v557_v8  ;;  %1007 = vmatmul.mubr.bf16.vlgmr.msra.gmra.mrb[16].mxu0 %v593_v4 }
 0x21d   :  { %v573_v7 = vmul.f32 %v1121_v3, %v565_v56  ;;  %v588_v9 = vmul.f32 %v580_v39, %v572_v1 }
 0x21e   :  { %v1123_v10 = vpop.eup %1122 }
 0x21f   :  { %v558_v11 = vmul.f32 %v1123_v10, %v537_v57  ;;  %v589_v12 = vmul.f32 %v581_v45, %v573_v7 }
 0x220   :  { %v1125_v2 = vpop.eup %1124 }
 0x221   :  { %v566_v14 = vsub.f32 2.0, %v558_v11  ;;  %v559_v15 = vmul.f32 %v1125_v2, %v541_v41  ;;  %v594_v19 = vpack.c.bf16 %v589_v12, %v588_v9 }
 0x223   :  { %v574_v20 = vmul.f32 %v1123_v10, %v566_v14  ;;  %v567_v21 = vsub.f32 2.0, %v559_v15  ;;  %1010 = vmatprep.mubr.bf16.mxu0 %v594_v19 }
 0x225   :  { %v575_v18 = vmul.f32 %v1125_v2, %v567_v21  ;;  %v590_v22 = vmul.f32 %v582_v55, %v574_v20 }
 0x227   :  { %v591_v23 = vmul.f32 %v583_v37, %v575_v18 }
 0x229   :  { %v595_v24 = vpack.c.bf16 %v591_v23, %v590_v22 }
 0x22b   :  { %1011 = vmatmul.mubr.bf16.gmra.mrb[20].mxu0 %v595_v24 }
 0x2ee   :  { %v1008_v27 = vpop.f32.mrb[16].mxu0 }
 0x2ef   :  { %v710_v32 = vadd.f32 %v1008_v27, %v931_v25  ;;  %v701_v33 = vpop.f32.mrb[17].mxu0 }
 0x2f0   :  { %v702_v36 = vadd.f32 %v931_v25, %v701_v33  ;;  %v1009_v39 = vpop.f32.mrb[18].mxu0 }
 0x2f1   :  { %v1440_v43 = vadd.f32 %v710_v32, %v1304_v28  ;;  %v713_v38 = vadd.f32 %v1009_v39, %v931_v25  ;;  %v704_v40 = vpop.f32.mrb[19].mxu0  ;;  %v1491_v32 = vld [vmem:[%s1539_s6] ss:$0 sm:$0xff]  ;;  %s1167_s6 = smov [#allocation2]  }
 0x2f2   :  { %v1443_v42 = vadd.f32 %v702_v36, %v1264_v16  ;;  %v705_v44 = vadd.f32 %v931_v25, %v704_v40 }
 0x2f3   :  { %744 = vadd.xlane.f32.xlu1 %v1440_v43  ;;  %v1448_v45 = vadd.f32 %v713_v38, %v1309_v29  ;;  %v767_v46 = vmul.f32 %v1440_v43, %v1440_v43 }
 0x2f4   :  { %740 = vadd.xlane.f32.xlu0 %v1443_v42  ;;  %v1454_v28 = vadd.f32 %v705_v44, %v1269_v17  ;;  %v765_v53 = vmul.f32 %v1443_v42, %v1443_v42  ;;  %v1497_v44 = vld [vmem:[%s1540_s7] ss:$0 sm:$0xff]  ;;  %s888_s7 = sshll.u32 %s1167_s6, 4  ;;  %s889_s7 = int_to_ptr.vmem [resolvable:$true] %s888_s7 }
 0x2f5   :  { %v768_v16 = vmul.f32 %v1448_v45, %v1448_v45  ;;  %s1142_s26 = scalar_lea.vmem %s889_s7, 1024  ;;  %p1147_p1 = scmp.lt.s32.totalorder %s889_s7, %s889_s7 }
 0x2f6   :  { %v766_v29 = vmul.f32 %v1454_v28, %v1454_v28  ;;  %p1143_p0 = scmp.ne.s32.totalorder %s889_s7, %s1142_s26  ;;  %p1148_p2 = scmp.lt.s32.totalorder %s1142_s26, %s1142_s26 }
 0x2f7   :  { %746 = vadd.xlane.f32.xlu1 %v1448_v45 }
 0x2f8   :  { %777 = vadd.xlane.f32.xlu0 %v767_v46  ;;  %p1149_p3 = por %p1148_p2, %p1147_p1 }
 0x2fa   :  { %p1150_p4 = pnand %p1149_p3, %p1143_p0 }
 0x2fb   :  { %779 = vadd.xlane.f32.xlu1 %v768_v16 }
 0x2fc   :  { %742 = vadd.xlane.f32.xlu0 %v1454_v28 }
 0x2fe   :  { %v1012_v47 = vpop.f32.mrb[20].mxu0 }
 0x2ff   :  { %v726_v48 = vadd.f32 %v1012_v47, %v931_v25  ;;  %v717_v59 = vpop.f32.mrb[21].mxu0  ;;  %775 = vadd.xlane.f32.xlu1 %v766_v29 }
 0x300   :  { %v1013_v49 = vpop.f32.mrb[22].mxu0  ;;  %773 = vadd.xlane.f32.xlu0 %v765_v53  ;;  %v718_v52 = vadd.f32 %v931_v25, %v717_v59 }
 0x301   :  { %v1464_v17 = vadd.f32 %v726_v48, %v1329_v34  ;;  %v729_v50 = vadd.f32 %v1013_v49, %v931_v25  ;;  %v720_v51 = vpop.f32.mrb[23].mxu0 }
 0x302   :  { %v721_v13 = vadd.f32 %v931_v25, %v720_v51  ;;  %v1472_v54 = vadd.f32 %v718_v52, %v1314_v30 }
 0x303   :  { %v1467_v6 = vadd.f32 %v729_v50, %v1334_v35  ;;  %v771_v57 = vmul.f32 %v1464_v17, %v1464_v17 }
 0x304   :  { %752 = vadd.xlane.f32.xlu0 %v1464_v17  ;;  %v1475_v55 = vadd.f32 %v721_v13, %v1319_v31  ;;  %v769_v34 = vmul.f32 %v1472_v54, %v1472_v54 }
 0x305   :  { %754 = vadd.xlane.f32.xlu1 %v1467_v6  ;;  %v772_v30 = vmul.f32 %v1467_v6, %v1467_v6 }
 0x306   :  { %v770_v35 = vmul.f32 %v1475_v55, %v1475_v55 }
 0x308   :  { %748 = vadd.xlane.f32.xlu0 %v1472_v54 }
 0x309   :  { %750 = vadd.xlane.f32.xlu1 %v1475_v55 }
 0x30c   :  { %781 = vadd.xlane.f32.xlu0 %v769_v34 }
 0x30d   :  { %783 = vadd.xlane.f32.xlu1 %v770_v35 }
 0x310   :  { %785 = vadd.xlane.f32.xlu0 %v771_v57 }
 0x311   :  { %787 = vadd.xlane.f32.xlu1 %v772_v30 }
 0x380   :  { %v745_v31 = vpop.xlane.xlu1 %744 }
 0x381   :  { %v741_v58 = vpop.xlane.xlu0 %740  ;;  %v759_v60 = vmul.f32 0.0078125, %v745_v31 }
 0x382   :  { %v757_v8 = vmul.f32 0.0078125, %v741_v58 }
 0x383   :  { %v799_v41 = vmul.f32 %v759_v60, %v759_v60  ;;  %v815_v24 = vsub.f32 %v1440_v43, %v759_v60 }
 0x384   :  { %v747_v26 = vpop.xlane.xlu1 %746  ;;  %v797_v14 = vmul.f32 %v757_v8, %v757_v8  ;;  %v813_v57 = vsub.f32 %v1443_v42, %v757_v8 }
 0x385   :  { %v760_v61 = vmul.f32 0.0078125, %v747_v26  ;;  %v778_v37 = vpop.xlane.xlu0 %777 }
 0x386   :  { %v791_v62 = vmul.f32 0.0078125, %v778_v37 }
 0x387   :  { %v800_v3 = vmul.f32 %v760_v61, %v760_v61  ;;  %v816_v40 = vsub.f32 %v1448_v45, %v760_v61 }
 0x388   :  { %v807_v63 = vsub.f32 %v791_v62, %v799_v41  ;;  %v780_v0 = vpop.xlane.xlu1 %779 }
 0x389   :  { %v792_v4 = vmul.f32 0.0078125, %v780_v0  ;;  %v743_v5 = vpop.xlane.xlu0 %742 }
 0x38a   :  { %v823_v1 = vadd.f32 1e-05, %v807_v63  ;;  %v758_v56 = vmul.f32 0.0078125, %v743_v5 }
 0x38b   :  { %v808_v7 = vsub.f32 %v792_v4, %v800_v3 }
 0x38c   :  { %1126 = vrsqrt.f32 %v823_v1  ;;  %v798_v9 = vmul.f32 %v758_v56, %v758_v56  ;;  %v776_v10 = vpop.xlane.xlu1 %775  ;;  %v814_v13 = vsub.f32 %v1454_v28, %v758_v56 }
 0x38d   :  { %v824_v11 = vadd.f32 1e-05, %v808_v7  ;;  %v790_v12 = vmul.f32 0.0078125, %v776_v10  ;;  %v774_v2 = vpop.xlane.xlu0 %773 }
 0x38e   :  { %v789_v15 = vmul.f32 0.0078125, %v774_v2 }
 0x38f   :  { %1128 = vrsqrt.f32 %v824_v11  ;;  %v806_v19 = vsub.f32 %v790_v12, %v798_v9 }
 0x390   :  { %v805_v20 = vsub.f32 %v789_v15, %v797_v14 }
 0x391   :  { %v822_v21 = vadd.f32 1e-05, %v806_v19  ;;  %v753_v18 = vpop.xlane.xlu0 %752 }
 0x392   :  { %v821_v22 = vadd.f32 1e-05, %v805_v20  ;;  %v755_v23 = vpop.xlane.xlu1 %754  ;;  %v763_v16 = vmul.f32 0.0078125, %v753_v18 }
 0x393   :  { %1130 = vrsqrt.f32 %v822_v21  ;;  %v764_v50 = vmul.f32 0.0078125, %v755_v23 }
 0x394   :  { %1132 = vrsqrt.f32 %v821_v22  ;;  %v803_v30 = vmul.f32 %v763_v16, %v763_v16  ;;  %v819_v19 = vsub.f32 %v1464_v17, %v763_v16 }
 0x395   :  { %v749_v25 = vpop.xlane.xlu0 %748  ;;  %v804_v0 = vmul.f32 %v764_v50, %v764_v50  ;;  %v820_v18 = vsub.f32 %v1467_v6, %v764_v50 }
 0x396   :  { %v1127_v27 = vpop.eup %1126  ;;  %v761_v33 = vmul.f32 0.0078125, %v749_v25  ;;  %v751_v36 = vpop.xlane.xlu1 %750 }
 0x397   :  { %v839_v39 = vmul.f32 %v1127_v27, %v815_v24  ;;  %v762_v38 = vmul.f32 0.0078125, %v751_v36 }
 0x398   :  { %v801_v53 = vmul.f32 %v761_v33, %v761_v33  ;;  %v817_v10 = vsub.f32 %v1472_v54, %v761_v33 }
 0x399   :  { %v1129_v46 = vpop.eup %1128  ;;  %v854_v43 = vmul.f32 %v1491_v32, %v839_v39  ;;  %v782_v29 = vpop.xlane.xlu0 %781  ;;  %v802_v51 = vmul.f32 %v762_v38, %v762_v38  ;;  %v818_v12 = vsub.f32 %v1475_v55, %v762_v38 }
 0x39a   :  { %v840_v47 = vmul.f32 %v1129_v46, %v816_v40  ;;  %v793_v48 = vmul.f32 0.0078125, %v782_v29  ;;  %v784_v59 = vpop.xlane.xlu1 %783 }
 0x39b   :  { %v869_v49 = vadd.f32 %v1497_v44, %v854_v43  ;;  %v794_v52 = vmul.f32 0.0078125, %v784_v59 }
 0x39c   :  { %v855_v45 = vmul.f32 %v1491_v32, %v840_v47  ;;  %v809_v34 = vsub.f32 %v793_v48, %v801_v53 }
 0x39d   :  { %v1131_v35 = vpop.eup %1130  ;;  %877 = vst [vmem:[#allocation2 + $0x10] sm:$0xff] %v869_v49  ;;  %v810_v31 = vsub.f32 %v794_v52, %v802_v51  ;;  %v786_v58 = vpop.xlane.xlu0 %785 }
 0x39e   :  { %v1133_v60 = vpop.eup %1132  ;;  %v870_v26 = vadd.f32 %v1497_v44, %v855_v45  ;;  %v838_v61 = vmul.f32 %v1131_v35, %v814_v13  ;;  %v825_v37 = vadd.f32 1e-05, %v809_v34  ;;  %v795_v41 = vmul.f32 0.0078125, %v786_v58  ;;  %v788_v62 = vpop.xlane.xlu1 %787 }
 0x39f   :  { %v837_v63 = vmul.f32 %v1133_v60, %v813_v57  ;;  %v826_v3 = vadd.f32 1e-05, %v810_v31  ;;  %v796_v4 = vmul.f32 0.0078125, %v788_v62 }
 0x3a0   :  { %878 = vst [vmem:[#allocation2 + $0x18] sm:$0xff] %v870_v26  ;;  %v853_v28 = vmul.f32 %v1491_v32, %v838_v61  ;;  %1134 = vrsqrt.f32 %v825_v37  ;;  %v811_v42 = vsub.f32 %v795_v41, %v803_v30 }
 0x3a1   :  { %v852_v5 = vmul.f32 %v1491_v32, %v837_v63  ;;  %1136 = vrsqrt.f32 %v826_v3  ;;  %v812_v8 = vsub.f32 %v796_v4, %v804_v0 }
 0x3a2   :  { %v868_v1 = vadd.f32 %v1497_v44, %v853_v28  ;;  %v827_v56 = vadd.f32 1e-05, %v811_v42 }
 0x3a3   :  { %v867_v7 = vadd.f32 %v1497_v44, %v852_v5  ;;  %v828_v9 = vadd.f32 1e-05, %v812_v8 }
 0x3a4   :  { %876 = vst [vmem:[#allocation2 + $0x8] sm:$0xff] %v868_v1  ;;  %1138 = vrsqrt.f32 %v827_v56 }
 0x3a5   :  { %875 = vst [vmem:[#allocation2] sm:$0xff] %v867_v7  ;;  %1140 = vrsqrt.f32 %v828_v9 }
 0x3aa   :  { %v1135_v11 = vpop.eup %1134 }
 0x3ab   :  { %v1137_v2 = vpop.eup %1136  ;;  %v841_v14 = vmul.f32 %v1135_v11, %v817_v10 }
 0x3ac   :  { %v842_v15 = vmul.f32 %v1137_v2, %v818_v12 }
 0x3ad   :  { %v856_v20 = vmul.f32 %v1491_v32, %v841_v14 }
 0x3ae   :  { %v1139_v21 = vpop.eup %1138  ;;  %v857_v22 = vmul.f32 %v1491_v32, %v842_v15 }
 0x3af   :  { %v1141_v23 = vpop.eup %1140  ;;  %v871_v24 = vadd.f32 %v1497_v44, %v856_v20  ;;  %v843_v25 = vmul.f32 %v1139_v21, %v819_v19 }
 0x3b0   :  { %v872_v54 = vadd.f32 %v1497_v44, %v857_v22  ;;  %v844_v27 = vmul.f32 %v1141_v23, %v820_v18 }
 0x3b1   :  { %879 = vst [vmem:[#allocation2 + $0x20] sm:$0xff] %v871_v24  ;;  %v858_v55 = vmul.f32 %v1491_v32, %v843_v25 }
 0x3b2   :  { %880 = vst [vmem:[#allocation2 + $0x28] sm:$0xff] %v872_v54  ;;  %v859_v17 = vmul.f32 %v1491_v32, %v844_v27 }
 0x3b3   :  { %v873_v33 = vadd.f32 %v1497_v44, %v858_v55 }
 0x3b4   :  { %v874_v6 = vadd.f32 %v1497_v44, %v859_v17 }
 0x3b5   :  { %881 = vst [vmem:[#allocation2 + $0x30] sm:$0xff] %v873_v33 }
 0x3b6   :  { %882 = vst [vmem:[#allocation2 + $0x38] sm:$0xff] %v874_v6 }
 0x3b7   :  { %1153 = shalt.err (!%p1150_p4)
}
 0x3b8   :  { %s1154_s29 = scalar_lea.hbm %s1541_s8, 1024 }
 0x3b9   :  { %p1155_p5 = scmp.ne.s32.totalorder %s1541_s8, %s1154_s29  ;;  %p1158_p6 = scmp.lt.u32.totalorder %s1154_s29, %s1541_s8 }
 0x3bb   :  { %p1160_p7 = pnand %p1158_p6, %p1155_p5 }
 0x3bd   :  { %1163 = shalt.err (!%p1160_p7)
}
 0x3be   :  { %s1168_s12 = smov 128   ;;  %s1169_s13 = smov 8  }
 0x3bf   :  { %894 = dma.vmem_to_hbm [thread:$0]  %s889_s7, 1024, %s1541_s8, [#allocation3], %s1168_s12, %s1168_s12, %s1169_s13  }
 0x3c0   :  { %1164 = dma.done.wait [#allocation3], 1024  }
 0x3c1   :  { %1165 = vsyncadd [#allocation3], 4294966272 }
 0x3c2   :  { %898 = vsyncpa [#allocation3], 1 }

</bundles_post_ra>
